<compile_context>
chip_gen: v7x
topology: tpu7x:2x2x1
jax: 0.10.0
libtpu: 0.0.40
codegen_flags: <defaults>
</compile_context>

<pallas_src>
import functools

import jax
import jax.numpy as jnp
from jax.experimental import pallas as pl
from jax.experimental.pallas import tpu as pltpu

_LANE = 128      # lane width  (last-dim vreg tiling)
_SUB = 8         # sublane width (second-to-last-dim vreg tiling)
_H1 = 512        # first hidden layer width  (fixed by the module)
_H2 = 32         # second hidden layer width (fixed by the module)

# VMEM budgeting: 48 MiB leaves headroom inside v7x's 64 MiB/TC and is far
# below v5e/v6e's 128 MiB physical VMEM; passing it as vmem_limit_bytes lifts
# the 16/32 MiB default scoped limits so large batch tiles don't spill.
_VMEM_LIMIT_BYTES = 48 * 1024 * 1024
_VMEM_TILE_BUDGET = 40 * 1024 * 1024


def _round_up(n, m):
    return ((n + m - 1) // m) * m


def _mlp_kernel(x_ref, w1_ref, b1_ref, w2_ref, b2_ref, w3_ref, b3_ref, o_ref):
    """Fused 3-layer MLP for one batch tile: relu(relu(x@W1+b1)@W2+b2)@W3+b3.

    Weights arrive pre-cast to bf16; x is cast to bf16 in-register, so every
    matmul runs on the native bf16 MXU path while accumulating in f32.
    """
    x = x_ref[...].astype(jnp.bfloat16)
    h1 = jnp.dot(x, w1_ref[...], preferred_element_type=jnp.float32) + b1_ref[...]
    h1 = jnp.maximum(h1, 0.0).astype(jnp.bfloat16)
    h2 = jnp.dot(h1, w2_ref[...], preferred_element_type=jnp.float32) + b2_ref[...]
    h2 = jnp.maximum(h2, 0.0).astype(jnp.bfloat16)
    out = jnp.dot(h2, w3_ref[...], preferred_element_type=jnp.float32) + b3_ref[...]
    o_ref[...] = out.astype(o_ref.dtype)


def prepare_params(params):
    """One-time parameter prep.  Keep this OUT of the per-call path.

    * Casts weights to bf16 (native MXU path).
    * Zero-pads only the final layer's output columns up to one 128-lane tile
      (unmasked output stores); padded columns are sliced off by the caller.
    * Biases stay f32 (added to the f32 accumulator).

    Returns (prepared_dict, out_dim).
    """
    w1 = params["w1"].astype(jnp.bfloat16)
    w2 = params["w2"].astype(jnp.bfloat16)
    b1 = params["b1"].astype(jnp.float32).reshape(1, -1)
    b2 = params["b2"].astype(jnp.float32).reshape(1, -1)
    w3 = params["w3"].astype(jnp.float32)
    b3 = params["b3"].astype(jnp.float32).reshape(1, -1)

    out_dim = w3.shape[1]
    out_p = _round_up(out_dim, _LANE)
    pad = out_p - out_dim
    if pad:
        w3 = jnp.pad(w3, ((0, 0), (0, pad)))
        b3 = jnp.pad(b3, ((0, 0), (0, pad)))

    prepared = {
        "w1": w1, "b1": b1,
        "w2": w2, "b2": b2,
        "w3": w3.astype(jnp.bfloat16), "b3": b3,
    }
    return prepared, out_dim


def _tile_vmem_bytes(bb, hidden, out_p):
    # Rough per-step VMEM accounting:
    #   x tile   : double-buffered, f32
    #   out tile : double-buffered, f32
    #   weights  : single-buffered bf16 (pl.Buffered(1)), biases f32
    #   in-kernel temporaries: bf16 x copy, f32+bf16 h1, f32+bf16 h2, f32 out
    x_bytes = 2 * bb * hidden * 4
    out_bytes = 2 * bb * out_p * 4
    w_bytes = (hidden * _H1 + _H1 * _H2 + _H2 * out_p) * 2
    b_bytes = (_H1 + _H2 + out_p) * 4
    tmp_bytes = bb * (2 * hidden + 6 * _H1 + 6 * _H2 + 4 * out_p)
    return x_bytes + out_bytes + w_bytes + b_bytes + tmp_bytes


def _choose_batch_tile(B, hidden, out_p, block_b):
    assert block_b % _SUB == 0, "block_b must be a multiple of 8"
    if B <= _SUB:
        bb = _SUB                                # nothing to split/pipeline
    elif B < 8 * _SUB:
        bb = _round_up(pl.cdiv(B, 2), _SUB)      # >=2 tiles: pipelining + 2 TCs (v7x)
    else:
        bb = _round_up(pl.cdiv(B, 4), _SUB)      # >=4 tiles once the batch is big
    bb = min(bb, block_b)
    # Shrink until the per-step working set fits the VMEM budget (relevant for
    # very large hidden_dim and v7x's 64 MiB VMEM).
    while bb > _SUB and _tile_vmem_bytes(bb, hidden, out_p) > _VMEM_TILE_BUDGET:
        bb = max(_SUB, _round_up(bb // 2, _SUB))
    return bb


@functools.partial(jax.jit, static_argnames=("out_dim", "block_b"))
def action_transformer_mlp(x, prepared, out_dim, block_b=1024):
    """Forward pass of ActionTransformerMLP.

    x:        (B, hidden_dim) float32
    prepared: output of prepare_params()
    out_dim:  7 * action_length (static)
    block_b:  maximum batch-tile size (multiple of 8, static)
    """
    w1, b1 = prepared["w1"], prepared["b1"]
    w2, b2 = prepared["w2"], prepared["b2"]
    w3, b3 = prepared["w3"], prepared["b3"]

    B, hidden = x.shape
    out_p = w3.shape[1]                      # 7*action_length padded to 128

    bb = _choose_batch_tile(B, hidden, out_p, block_b)
    grid = (pl.cdiv(B, bb),)                 # partial last tile handled by Pallas

    # Resident operands: constant index map (DMA'd once) + single-buffered.
    resident = dict(pipeline_mode=pl.Buffered(buffer_count=1))

    flops = 2 * B * (hidden * _H1 + _H1 * _H2 + _H2 * out_p)
    bytes_accessed = (
        4 * B * hidden + 4 * B * out_p
        + 2 * (hidden * _H1 + _H1 * _H2 + _H2 * out_p)
        + 4 * (_H1 + _H2 + out_p)
    )

    out_padded = pl.pallas_call(
        _mlp_kernel,
        out_shape=jax.ShapeDtypeStruct((B, out_p), jnp.float32),
        grid_spec=pltpu.PrefetchScalarGridSpec(
            num_scalar_prefetch=0,
            grid=grid,
            in_specs=[
                pl.BlockSpec((bb, hidden), lambda i: (i, 0)),           # x tile
                pl.BlockSpec(w1.shape, lambda i: (0, 0), **resident),   # W1
                pl.BlockSpec(b1.shape, lambda i: (0, 0), **resident),   # b1
                pl.BlockSpec(w2.shape, lambda i: (0, 0), **resident),   # W2
                pl.BlockSpec(b2.shape, lambda i: (0, 0), **resident),   # b2
                pl.BlockSpec(w3.shape, lambda i: (0, 0), **resident),   # W3
                pl.BlockSpec(b3.shape, lambda i: (0, 0), **resident),   # b3
            ],
            out_specs=pl.BlockSpec((bb, out_p), lambda i: (i, 0)),
        ),
        compiler_params=pltpu.CompilerParams(
            dimension_semantics=("parallel",),
            vmem_limit_bytes=_VMEM_LIMIT_BYTES,
        ),
        cost_estimate=pl.CostEstimate(
            flops=flops, transcendentals=0, bytes_accessed=bytes_accessed),
    )(x, w1, b1, w2, b2, w3, b3)

    # Strip the lane padding (7*action_length -> out_dim). Consumers that can
    # take the padded (B, 128) slab may skip this extra HBM pass.
    return out_padded[:, :out_dim]


def init_params(key, hidden_dim=512, action_length=1):
    """Deterministic synthetic parameters (shapes match the PyTorch module).

    Weights are stored as (in_features, out_features) so the kernel computes
    y = x @ W + b, identical math to PyTorch's x @ W_pt.T + b.
    """
    dims = [(hidden_dim, _H1), (_H1, _H2), (_H2, 7 * action_length)]
    params = {}
    for idx, (fan_in, fan_out) in enumerate(dims, start=1):
        key, kw, kb = jax.random.split(key, 3)
        bound = 1.0 / jnp.sqrt(fan_in)
        params[f"w{idx}"] = jax.random.uniform(
            kw, (fan_in, fan_out), jnp.float32, -bound, bound)
        params[f"b{idx}"] = jax.random.uniform(
            kb, (1, fan_out), jnp.float32, -bound, bound)
    return params


def reference_forward(x, params):
    h1 = jnp.maximum(x @ params["w1"] + params["b1"], 0.0)
    h2 = jnp.maximum(h1 @ params["w2"] + params["b2"], 0.0)
    return h2 @ params["w3"] + params["b3"]


if __name__ == "__main__":
    # Small shapes consistent with the module: hidden_dim=32, action_length=1.
    hidden_dim = 32
    action_length = 1

    key = jax.random.PRNGKey(0)
    params = init_params(key, hidden_dim=hidden_dim, action_length=action_length)
    prepared, out_dim = prepare_params(params)   # once, outside the hot path

    # batch=8  -> single tile; batch=37 -> 2 tiles with a partial last tile
    # (exercises the cdiv grid / no-x-padding path).
    for batch in (8, 37):
        key, kx = jax.random.split(key)
        x = jax.random.normal(kx, (batch, hidden_dim), dtype=jnp.float32)

        out = jax.block_until_ready(
            action_transformer_mlp(x, prepared, out_dim=out_dim))
        ref = reference_forward(x, params)

        assert out.shape == (batch, 7 * action_length), out.shape
        # bf16 matmuls with f32 accumulation -> relaxed tolerance vs f32 ref.
        assert jnp.allclose(out, ref, atol=2e-2, rtol=2e-2), (
            f"mismatch vs reference (batch={batch}), "
            f"max err={float(jnp.max(jnp.abs(out - ref)))}")

    print("KERNEL_OK")
</pallas_src>

<mosaic_0001>
module attributes {stable_mosaic.version = 11 : i64} {
  func.func @_mlp_kernel(%arg0: i32, %arg1: memref<8x32xf32, #tpu.memory_space<vmem>>, %arg2: memref<32x512xbf16, #tpu.memory_space<vmem>>, %arg3: memref<1x512xf32, #tpu.memory_space<vmem>>, %arg4: memref<512x32xbf16, #tpu.memory_space<vmem>>, %arg5: memref<1x32xf32, #tpu.memory_space<vmem>>, %arg6: memref<32x128xbf16, #tpu.memory_space<vmem>>, %arg7: memref<1x128xf32, #tpu.memory_space<vmem>>, %arg8: memref<8x128xf32, #tpu.memory_space<vmem>>) attributes {dimension_semantics = [#tpu.dimension_semantics<parallel>], iteration_bounds = array<i64: 1>, scalar_prefetch = 0 : i64, scratch_operands = 0 : i64, tpu.core_type = #tpu.core_type<tc>, window_params = [{transform_indices = @transform_0, window_bounds = array<i64: 8, 32>}, {pipeline_mode = #tpu.pipeline_mode<synchronous>, transform_indices = @transform_1, window_bounds = array<i64: 32, 512>}, {pipeline_mode = #tpu.pipeline_mode<synchronous>, transform_indices = @transform_2, window_bounds = array<i64: 1, 512>}, {pipeline_mode = #tpu.pipeline_mode<synchronous>, transform_indices = @transform_3, window_bounds = array<i64: 512, 32>}, {pipeline_mode = #tpu.pipeline_mode<synchronous>, transform_indices = @transform_4, window_bounds = array<i64: 1, 32>}, {pipeline_mode = #tpu.pipeline_mode<synchronous>, transform_indices = @transform_5, window_bounds = array<i64: 32, 128>}, {pipeline_mode = #tpu.pipeline_mode<synchronous>, transform_indices = @transform_6, window_bounds = array<i64: 1, 128>}, {transform_indices = @transform_7, window_bounds = array<i64: 8, 128>}]} {
    %c0 = arith.constant 0 : index
    %c0_0 = arith.constant 0 : index
    %0 = vector.load %arg1[%c0, %c0_0] : memref<8x32xf32, #tpu.memory_space<vmem>>, vector<8x32xf32>
    %1 = arith.truncf %0 : vector<8x32xf32> to vector<8x32xbf16>
    %c0_1 = arith.constant 0 : index
    %c0_2 = arith.constant 0 : index
    %2 = vector.load %arg2[%c0_1, %c0_2] : memref<32x512xbf16, #tpu.memory_space<vmem>>, vector<32x512xbf16>
    %cst = arith.constant dense<0.000000e+00> : vector<8x512xf32>
    %3 = tpu.matmul %1, %2, %cst {dimension_numbers = #tpu.dot_dimension_numbers<[1], [0], [0], [1], [0, 0, 1, 1], [], []>} : vector<8x32xbf16>, vector<32x512xbf16>, vector<8x512xf32> -> vector<8x512xf32>
    %c0_3 = arith.constant 0 : index
    %c0_4 = arith.constant 0 : index
    %4 = vector.load %arg3[%c0_3, %c0_4] : memref<1x512xf32, #tpu.memory_space<vmem>>, vector<1x512xf32>
    %5 = vector.broadcast %4 : vector<1x512xf32> to vector<8x512xf32>
    %6 = arith.addf %3, %5 : vector<8x512xf32>
    %cst_5 = arith.constant 0.000000e+00 : f32
    %7 = vector.broadcast %cst_5 : f32 to vector<8x512xf32>
    %8 = arith.maximumf %6, %7 : vector<8x512xf32>
    %9 = arith.truncf %8 : vector<8x512xf32> to vector<8x512xbf16>
    %c0_6 = arith.constant 0 : index
    %c0_7 = arith.constant 0 : index
    %10 = vector.load %arg4[%c0_6, %c0_7] : memref<512x32xbf16, #tpu.memory_space<vmem>>, vector<512x32xbf16>
    %cst_8 = arith.constant dense<0.000000e+00> : vector<8x32xf32>
    %11 = tpu.matmul %9, %10, %cst_8 {dimension_numbers = #tpu.dot_dimension_numbers<[1], [0], [0], [1], [0, 0, 1, 1], [], []>} : vector<8x512xbf16>, vector<512x32xbf16>, vector<8x32xf32> -> vector<8x32xf32>
    %c0_9 = arith.constant 0 : index
    %c0_10 = arith.constant 0 : index
    %12 = vector.load %arg5[%c0_9, %c0_10] : memref<1x32xf32, #tpu.memory_space<vmem>>, vector<1x32xf32>
    %13 = vector.broadcast %12 : vector<1x32xf32> to vector<8x32xf32>
    %14 = arith.addf %11, %13 : vector<8x32xf32>
    %cst_11 = arith.constant 0.000000e+00 : f32
    %15 = vector.broadcast %cst_11 : f32 to vector<8x32xf32>
    %16 = arith.maximumf %14, %15 : vector<8x32xf32>
    %17 = arith.truncf %16 : vector<8x32xf32> to vector<8x32xbf16>
    %c0_12 = arith.constant 0 : index
    %c0_13 = arith.constant 0 : index
    %18 = vector.load %arg6[%c0_12, %c0_13] : memref<32x128xbf16, #tpu.memory_space<vmem>>, vector<32x128xbf16>
    %cst_14 = arith.constant dense<0.000000e+00> : vector<8x128xf32>
    %19 = tpu.matmul %17, %18, %cst_14 {dimension_numbers = #tpu.dot_dimension_numbers<[1], [0], [0], [1], [0, 0, 1, 1], [], []>} : vector<8x32xbf16>, vector<32x128xbf16>, vector<8x128xf32> -> vector<8x128xf32>
    %c0_15 = arith.constant 0 : index
    %c0_16 = arith.constant 0 : index
    %20 = vector.load %arg7[%c0_15, %c0_16] : memref<1x128xf32, #tpu.memory_space<vmem>>, vector<1x128xf32>
    %21 = vector.broadcast %20 : vector<1x128xf32> to vector<8x128xf32>
    %22 = arith.addf %19, %21 : vector<8x128xf32>
    %c0_17 = arith.constant 0 : index
    %c0_18 = arith.constant 0 : index
    %23 = vector.load %arg8[%c0_17, %c0_18] : memref<8x128xf32, #tpu.memory_space<vmem>>, vector<8x128xf32>
    tpu.vector_store %arg8[%c0_17, %c0_18], %22 {strides = array<i32>} : memref<8x128xf32, #tpu.memory_space<vmem>>, vector<8x128xf32>,
    return
  }
  func.func @transform_0(%arg0: i32) -> (i32, i32) {
    %c0_i32 = arith.constant 0 : i32
    %c0_i32_0 = arith.constant 0 : i32
    return %arg0, %c0_i32 : i32, i32
  }
  func.func @transform_1(%arg0: i32) -> (i32, i32) {
    %c0_i32 = arith.constant 0 : i32
    %c0_i32_0 = arith.constant 0 : i32
    %c0_i32_1 = arith.constant 0 : i32
    return %c0_i32, %c0_i32_0 : i32, i32
  }
  func.func @transform_2(%arg0: i32) -> (i32, i32) {
    %c0_i32 = arith.constant 0 : i32
    %c0_i32_0 = arith.constant 0 : i32
    %c0_i32_1 = arith.constant 0 : i32
    return %c0_i32, %c0_i32_0 : i32, i32
  }
  func.func @transform_3(%arg0: i32) -> (i32, i32) {
    %c0_i32 = arith.constant 0 : i32
    %c0_i32_0 = arith.constant 0 : i32
    %c0_i32_1 = arith.constant 0 : i32
    return %c0_i32, %c0_i32_0 : i32, i32
  }
  func.func @transform_4(%arg0: i32) -> (i32, i32) {
    %c0_i32 = arith.constant 0 : i32
    %c0_i32_0 = arith.constant 0 : i32
    %c0_i32_1 = arith.constant 0 : i32
    return %c0_i32, %c0_i32_0 : i32, i32
  }
  func.func @transform_5(%arg0: i32) -> (i32, i32) {
    %c0_i32 = arith.constant 0 : i32
    %c0_i32_0 = arith.constant 0 : i32
    %c0_i32_1 = arith.constant 0 : i32
    return %c0_i32, %c0_i32_0 : i32, i32
  }
  func.func @transform_6(%arg0: i32) -> (i32, i32) {
    %c0_i32 = arith.constant 0 : i32
    %c0_i32_0 = arith.constant 0 : i32
    %c0_i32_1 = arith.constant 0 : i32
    return %c0_i32, %c0_i32_0 : i32, i32
  }
  func.func @transform_7(%arg0: i32) -> (i32, i32) {
    %c0_i32 = arith.constant 0 : i32
    %c0_i32_0 = arith.constant 0 : i32
    return %arg0, %c0_i32 : i32, i32
  }
}

</mosaic_0001>

<bundles_post_ra>
// kernel: action_transformer_mlp.1
= control target key start
LH: loop header
LB: loop body
LE: loop exit
PB: predicated region body
PF: predicated region fallthrough
CT: control target
= control target key end

     0   :  { %v796_v2 = vmov 0   ;;  %vm100_vm0 = vcmask 261120   ;;  %s993_s0 = inlined_call_operand.vmem [shape: f32[8,32], index: 0, kind: input, shape index: {}]   ;;  %s994_s1 = inlined_call_operand.vmem [shape: bf16[32,512], index: 1, kind: input, shape index: {}]   ;;  %s995_s2 = inlined_call_operand.vmem [shape: f32[1,512], index: 2, kind: input, shape index: {}]   ;;  %s996_s3 = inlined_call_operand.vmem [shape: bf16[512,32], index: 3, kind: input, shape index: {}]   ;;  %s997_s4 = inlined_call_operand.vmem [shape: f32[1,32], index: 4, kind: input, shape index: {}]   ;;  %s998_s5 = inlined_call_operand.vmem [shape: bf16[32,128], index: 5, kind: input, shape index: {}]   ;;  %s999_s6 = inlined_call_operand.vmem [shape: f32[1,128], index: 6, kind: input, shape index: {}]   ;;  %s1000_s7 = inlined_call_operand.hbm [shape: f32[8,128], index: 7, kind: output, shape index: {}]  }
   0x1   :  { %v726_v0 = vld [vmem:[%s994_s1 + $0x4] ss:$16 sps:$4 sm:$0xff]   ;;  %v728_v1 = vld [vmem:[%s994_s1 + $0xc] ss:$16 sps:$4 sm:$0xff]   ;;  %136 = vmatprep.mubr.bf16.mxu0 %v796_v2  ;;  %177 = vmatprep.mubr.bf16.mxu1 %v796_v2  ;;  %v730_v3 = vld [vmem:[%s994_s1] ss:$16 sps:$4 sm:$0xff]  }
   0x2   :  { %104 = vmatprep.subr.bf16.mxu0 %v726_v0  ;;  %v731_v4 = vld [vmem:[%s994_s1 + $0x8] ss:$16 sps:$4 sm:$0xff]   ;;  %145 = vmatprep.subr.bf16.mxu1 %v728_v1  ;;  %v732_v5 = vld [vmem:[%s994_s1 + $0x24] ss:$16 sps:$4 sm:$0xff]   ;;  %v734_v6 = vld [vmem:[%s994_s1 + $0x2c] ss:$16 sps:$4 sm:$0xff]  }
   0x3   :  { %105 = vmatpush1.bf16.msra.mxu0 %v730_v3  ;;  %146 = vmatpush1.bf16.msra.mxu1 %v731_v4  ;;  %v736_v7 = vld [vmem:[%s994_s1 + $0x20] ss:$16 sps:$4 sm:$0xff]   ;;  %v737_v8 = vld [vmem:[%s994_s1 + $0x28] ss:$16 sps:$4 sm:$0xff]  }
   0x4   :  { %106 = vmatprep.subr.bf16.mxu0 %v732_v5  ;;  %v28_v9 = vld [vmem:[%s993_s0] sm:$0xff]  ;;  %147 = vmatprep.subr.bf16.mxu1 %v734_v6  ;;  %v742_v15 = vld [vmem:[%s996_s3 + $0x48] sm:$0xff]   ;;  %v746_v19 = vld [vmem:[%s996_s3 + $0x50] sm:$0xff]  }
   0x5   :  { %v738_v10 = vld [vmem:[%s996_s3 + $0x40] sm:$0xff]   ;;  %v29_v11 = vpack.c.bf16 %v28_v9, %v28_v9  ;;  %v743_v16 = vld [vmem:[%s996_s3 + $0xc8] sm:$0xff]   ;;  %v747_v20 = vld [vmem:[%s996_s3 + $0xd0] sm:$0xff]  }
   0x6   :  { %v739_v12 = vld [vmem:[%s996_s3 + $0xc0] sm:$0xff]   ;;  %v744_v17 = vld [vmem:[%s996_s3 + $0x8] sm:$0xff]   ;;  %v748_v21 = vld [vmem:[%s996_s3 + $0x10] sm:$0xff]  }
   0x7   :  { %107 = vmatpush1.bf16.msra.mxu0 %v736_v7  ;;  %148 = vmatpush1.bf16.msra.mxu1 %v737_v8  ;;  %v740_v13 = vld [vmem:[%s996_s3] sm:$0xff]   ;;  %v745_v18 = vld [vmem:[%s996_s3 + $0x88] sm:$0xff]   ;;  %v749_v22 = vld [vmem:[%s996_s3 + $0x90] sm:$0xff]  }
   0x8   :  { %667 = vmatprep.subr.bf16.mxu0 %v738_v10  ;;  %689 = vmatprep.subr.bf16.mxu1 %v739_v12  ;;  %v741_v14 = vld [vmem:[%s996_s3 + $0x80] sm:$0xff]   ;;  %v750_v23 = vld [vmem:[%s996_s3 + $0x58] sm:$0xff]   ;;  %v758_v31 = vld [vmem:[%s996_s3 + $0x68] sm:$0xff]  }
   0x9   :  { %v751_v24 = vld [vmem:[%s996_s3 + $0xd8] sm:$0xff]   ;;  %v754_v27 = vld [vmem:[%s996_s3 + $0x60] sm:$0xff]   ;;  %v759_v32 = vld [vmem:[%s996_s3 + $0xe8] sm:$0xff]  }
   0xa   :  { %628 = vmatmul.mubr.msk.bf16.vlgmr.msra.gmra.mrb[0].mxu0 %vm100_vm0, %v29_v11  ;;  %629 = vmatmul.mubr.msk.bf16.vlgmr.msra.gmra.mrb[0].mxu1 %vm100_vm0, %v29_v11  ;;  %v752_v25 = vld [vmem:[%s996_s3 + $0x18] sm:$0xff]   ;;  %v755_v28 = vld [vmem:[%s996_s3 + $0xe0] sm:$0xff]   ;;  %v760_v33 = vld [vmem:[%s996_s3 + $0x28] sm:$0xff]  }
   0xb   :  { %668 = vmatpush3.bf16.msra.mxu0 %v740_v13  ;;  %690 = vmatpush3.bf16.msra.mxu1 %v741_v14  ;;  %v753_v26 = vld [vmem:[%s996_s3 + $0x98] sm:$0xff]   ;;  %v756_v29 = vld [vmem:[%s996_s3 + $0x20] sm:$0xff]   ;;  %v761_v34 = vld [vmem:[%s996_s3 + $0xa8] sm:$0xff]  }
   0xc   :  { %669 = vmatprep.subr.bf16.mxu0 %v742_v15  ;;  %691 = vmatprep.subr.bf16.mxu1 %v743_v16  ;;  %v757_v30 = vld [vmem:[%s996_s3 + $0xa0] sm:$0xff]  }
   0xf   :  { %670 = vmatpush3.bf16.msra.mxu0 %v744_v17  ;;  %692 = vmatpush3.bf16.msra.mxu1 %v745_v18 }
  0x10   :  { %671 = vmatprep.subr.bf16.mxu0 %v746_v19  ;;  %693 = vmatprep.subr.bf16.mxu1 %v747_v20 }
  0x13   :  { %672 = vmatpush3.bf16.msra.mxu0 %v748_v21  ;;  %694 = vmatpush3.bf16.msra.mxu1 %v749_v22 }
  0x14   :  { %673 = vmatprep.subr.bf16.mxu0 %v750_v23  ;;  %695 = vmatprep.subr.bf16.mxu1 %v751_v24 }
  0x17   :  { %674 = vmatpush3.bf16.msra.mxu0 %v752_v25  ;;  %696 = vmatpush3.bf16.msra.mxu1 %v753_v26 }
  0x18   :  { %675 = vmatprep.subr.bf16.mxu0 %v754_v27  ;;  %697 = vmatprep.subr.bf16.mxu1 %v755_v28 }
  0x1b   :  { %676 = vmatpush3.bf16.msra.mxu0 %v756_v29  ;;  %698 = vmatpush3.bf16.msra.mxu1 %v757_v30 }
  0x1c   :  { %677 = vmatprep.subr.bf16.mxu0 %v758_v31  ;;  %699 = vmatprep.subr.bf16.mxu1 %v759_v32 }
  0x1f   :  { %678 = vmatpush3.bf16.msra.mxu0 %v760_v33  ;;  %700 = vmatpush3.bf16.msra.mxu1 %v761_v34 }
  0x20   :  { %12 = vsyncpa [#allocation3], 0  ;;  %v762_v35 = vld [vmem:[%s996_s3 + $0x70] sm:$0xff]   ;;  %v766_v39 = vld [vmem:[%s996_s3 + $0x78] sm:$0xff]   ;;  %v40_v43 = vlaneseq  ;;  %v797_v11 = vmov 0.0   ;;  %vm798_vm1 = vmmov 0  }
  0x21   :  { %v763_v36 = vld [vmem:[%s996_s3 + $0xf0] sm:$0xff]   ;;  %679 = vmatprep.subr.bf16.mxu0 %v762_v35  ;;  %v767_v40 = vld [vmem:[%s996_s3 + $0xf8] sm:$0xff]   ;;  %v38_v47 = vld [vmem:[%s995_s2] sm:$0xf]  ;;  %s799_s15 = smov [#allocation2]  }
  0x22   :  { %v764_v37 = vld [vmem:[%s996_s3 + $0x30] sm:$0xff]   ;;  %701 = vmatprep.subr.bf16.mxu1 %v763_v36  ;;  %v768_v41 = vld [vmem:[%s996_s3 + $0x38] sm:$0xff]   ;;  %v41_v44 = vshrl.u32 %v40_v43, 7  ;;  %v770_v10 = vld [vmem:[%s998_s5] sm:$0xff]  }
  0x23   :  { %v765_v38 = vld [vmem:[%s996_s3 + $0xb0] sm:$0xff]   ;;  %680 = vmatpush3.bf16.msra.mxu0 %v764_v37  ;;  %v769_v42 = vld [vmem:[%s996_s3 + $0xb8] sm:$0xff]   ;;  %v771_v12 = vld [vmem:[%s998_s5 + $0x8] sm:$0xff]  }
  0x24   :  { %702 = vmatpush3.bf16.msra.mxu1 %v765_v38  ;;  %681 = vmatprep.subr.bf16.mxu0 %v766_v39  ;;  %v42_v45 = vsub.s32 0, %v41_v44  ;;  %v50_v46 = vsub.s32 2, %v41_v44  ;;  %v46_v48 = vsub.s32 1, %v41_v44  ;;  %v54_v49 = vsub.s32 3, %v41_v44  ;;  %v630_v15 = vld [vmem:[%s997_s4] ss:$0 sm:$0xff] }
  0x25   :  { %703 = vmatprep.subr.bf16.mxu1 %v767_v40  ;;  %v663_v28 = vld [vmem:[%s999_s6] ss:$0 sm:$0xff]  ;;  %s612_s4 = sshll.u32 %s799_s15, 4  ;;  %s613_s4 = int_to_ptr.vmem [resolvable:$true] %s612_s4 }
  0x26   :  { %v43_v50 = vrot.slane %v38_v47, %v42_v45  ;;  %v51_v51 = vrot.slane %v38_v47, %v50_v46  ;;  %v47_v52 = vrot.slane %v38_v47, %v46_v48  ;;  %v55_v53 = vrot.slane %v38_v47, %v54_v49  ;;  %s772_s16 = scalar_lea.vmem %s613_s4, 128  ;;  %p777_p1 = scmp.lt.s32.totalorder %s613_s4, %s613_s4 }
  0x27   :  { %682 = vmatpush3.bf16.msra.mxu0 %v768_v41  ;;  %p773_p0 = scmp.ne.s32.totalorder %s613_s4, %s772_s16  ;;  %p778_p2 = scmp.lt.s32.totalorder %s772_s16, %s772_s16 }
  0x28   :  { %704 = vmatpush3.bf16.msra.mxu1 %v769_v42  ;;  %714 = vmatprep.subr.bf16.mxu0 %v797_v11 }
  0x29   :  { %p779_p3 = por %p778_p2, %p777_p1 }
  0x2b   :  { %p780_p4 = pnand %p779_p3, %p773_p0 }
  0xdd   :  { %v138_v54 = vpop.f32.mrb[0].mxu0  ;;  %v179_v55 = vpop.f32.mrb[0].mxu1 }
  0xde   :  { %v139_v56 = vadd.f32 %v138_v54, %v43_v50  ;;  %v180_v57 = vadd.f32 %v179_v55, %v51_v51  ;;  %v140_v58 = vpop.f32.mrb[1].mxu0  ;;  %v181_v59 = vpop.f32.mrb[1].mxu1 }
  0xdf   :  { %v141_v60 = vadd.f32 %v140_v58, %v47_v52  ;;  %v182_v61 = vadd.f32 %v181_v59, %v55_v53  ;;  %v142_v62 = vpop.f32.mrb[2].mxu0  ;;  %v183_v63 = vpop.f32.mrb[2].mxu1 }
  0xe0   :  { %v186_v0 = vmax.f32 %v139_v56, 0.0  ;;  %v188_v1 = vmax.f32 %v180_v57, 0.0  ;;  %v143_v2 = vpop.f32.mrb[3].mxu0  ;;  %v184_v3 = vpop.f32.mrb[3].mxu1 }
  0xe1   :  { %v187_v4 = vmax.f32 %v141_v60, 0.0  ;;  %v189_v5 = vmax.f32 %v182_v61, 0.0 }
  0xe2   :  { %v192_v6 = vpack.c.bf16 %v188_v1, %v188_v1  ;;  %v190_v9 = vpack.c.bf16 %v186_v0, %v186_v0 }
  0xe3   :  { %v191_v7 = vpack.c.bf16 %v187_v4, %v187_v4  ;;  %v193_v8 = vpack.c.bf16 %v189_v5, %v189_v5 }
  0xe5   :  { %489 = vmatprep.mubr.bf16.mxu0 %v191_v7  ;;  %529 = vmatprep.mubr.bf16.mxu1 %v193_v8 }
  0xe6   :  { %490 = vmatmul.mubr.bf16.vlgmr.msra.gmra.mrb[4].mxu0 %v190_v9  ;;  %530 = vmatmul.mubr.bf16.vlgmr.msra.gmra.mrb[4].mxu1 %v192_v6 }
  0xe7   :  { %715 = vmatpush3.bf16.msra.mxu0 %v770_v10  ;;  %718 = vmatprep.mubr.msk.bf16.mxu0 %vm798_vm1, %v797_v11 }
  0xe8   :  { %716 = vmatprep.subr.bf16.mxu0 %v797_v11 }
  0xeb   :  { %717 = vmatpush3.bf16.msra.mxu0 %v771_v12 }
 0x1b9   :  { %v683_v13 = vpop.f32.mrb[4].mxu0  ;;  %v705_v14 = vpop.f32.mrb[4].mxu1 }
 0x1ba   :  { %v684_v16 = vpop.f32.mrb[5].mxu0  ;;  %v706_v17 = vpop.f32.mrb[5].mxu1 }
 0x1bb   :  { %v685_v18 = vadd.f32 %v684_v16, %v683_v13  ;;  %v707_v19 = vadd.f32 %v706_v17, %v705_v14  ;;  %v686_v20 = vpop.f32.mrb[6].mxu0  ;;  %v708_v21 = vpop.f32.mrb[6].mxu1 }
 0x1bc   :  { %v687_v22 = vpop.f32.mrb[7].mxu0  ;;  %v709_v23 = vpop.f32.mrb[7].mxu1 }
 0x1bd   :  { %v492_v24 = vadd.f32 %v685_v18, %v630_v15 }
 0x1bf   :  { %v532_v25 = vadd.f32 %v707_v19, %v492_v24 }
 0x1c1   :  { %v537_v26 = vmax.f32 %v532_v25, 0.0 }
 0x1c3   :  { %v538_v27 = vpack.c.bf16 %v537_v26, %v537_v26 }
 0x1c5   :  { %719 = vmatmul.mubr.msk.bf16.vlgmr.msra.gmra.mrb[8].mxu0 %vm100_vm0, %v538_v27 }
 0x298   :  { %v599_v29 = vpop.f32.mrb[8].mxu0 }
 0x299   :  { %v600_v30 = vadd.f32 %v663_v28, %v599_v29  ;;  %v720_v31 = vpop.f32.mrb[9].mxu0 }
 0x29a   :  { %v602_v32 = vpop.f32.mrb[10].mxu0 }
 0x29b   :  { %605 = vst [vmem:[#allocation2] sm:$0xff] %v600_v30  ;;  %v721_v33 = vpop.f32.mrb[11].mxu0 }
 0x29c   :  { %783 = shalt.err (!%p780_p4)
}
 0x29d   :  { %s784_s6 = scalar_lea.hbm %s1000_s7, 128 }
 0x29e   :  { %p785_p5 = scmp.ne.s32.totalorder %s1000_s7, %s784_s6  ;;  %p788_p6 = scmp.lt.u32.totalorder %s784_s6, %s1000_s7 }
 0x2a0   :  { %p790_p7 = pnand %p788_p6, %p785_p5 }
 0x2a2   :  { %793 = shalt.err (!%p790_p7)
}
 0x2a3   :  { %615 = dma.vmem_to_hbm [thread:$0]  %s613_s4, 128, %s1000_s7, [#allocation3]  }
 0x2a4   :  { %794 = dma.done.wait [#allocation3], 128  }
 0x2a5   :  { %795 = vsyncadd [#allocation3], 4294967168 }
 0x2a6   :  { %619 = vsyncpa [#allocation3], 1 }

</bundles_post_ra>
